<compile_context>
chip_gen: v7x
topology: tpu7x:2x2x1
jax: 0.10.0
libtpu: 0.0.40
codegen_flags: <defaults>
</compile_context>

<pallas_src>
import jax
import jax.numpy as jnp
from jax.experimental import pallas as pl
from jax.experimental.pallas import tpu as pltpu

LANES = 128


def _ceil_to(x, m):
    return ((x + m - 1) // m) * m


def _make_kernel(row_block, steps, rows, need_mask):
    """Build the DRM-loss kernel for a given static tiling."""

    def kernel(ip_ref, pred_ref, label_ref, flag_ref, acc_ref):
        # acc_ref is an (8, LANES) f32 block resident across the sequential
        # reduction axis (grid axis 1).  Zero it on the first step.
        @pl.when(pl.program_id(1) == 0)
        def _():
            acc_ref[...] = jnp.zeros_like(acc_ref)

        pred = pred_ref[...].astype(jnp.float32)
        label = label_ref[...].astype(jnp.float32)
        flag = flag_ref[...].astype(jnp.float32)

        # l(true, pred) = (true - pred)^2
        diff = label - pred
        sq = diff * diff

        # index = (int(label)+1)//2 : label <= 0 -> ip[0], label > 0 -> ip[1]
        ip0 = ip_ref[0]
        ip1 = ip_ref[1]
        dip = ip1 - ip0                                  # scalar (SMEM) op, hoisted
        pos = (label > 0.0).astype(jnp.float32)
        sel = (flag == 1.0).astype(jnp.float32)          # exact gate, matches PyTorch
        weight = sel * (ip0 + dip * pos)

        # Fused single term:
        #   IPS - 0.001*sum(sq) + 0.001*sum(sq*(1-flag)) == sum(sq*(weight - 0.001*flag))
        contrib = sq * (weight - 0.001 * flag)

        if need_mask:
            # Last (edge) block extends past the true row count; its tail rows
            # hold unspecified VMEM data -> mask by global row index.
            row0 = (pl.program_id(0) * steps + pl.program_id(1)) * row_block
            r = jax.lax.broadcasted_iota(jnp.int32, (row_block, LANES), 0)
            contrib = jnp.where((row0 + r) < rows, contrib, 0.0)

        # Partial reduce to one (8, LANES) vreg-shaped slab with pure VPU adds.
        # Two-level tree keeps the add dependency chain short (v7x).
        rb = row_block
        if rb >= 64 and rb % 64 == 0:
            part = contrib.reshape(rb // 64, 8, 8, LANES).sum(axis=1).sum(axis=0)
        else:
            part = contrib.reshape(rb // 8, 8, LANES).sum(axis=0)
        acc_ref[...] += part

    return kernel


def drm_loss(output, label, inverse_propensity, flag, *,
             max_row_block=4096, num_splits=1, core_parallel=False):
    """Pallas implementation of DRMLoss.forward. Returns a scalar f32 loss.

    num_splits > 1 adds a leading grid axis (each split accumulates into its
    own (8,128) slab); set core_parallel=True on v7x to shard that axis across
    the two TensorCores.
    """
    n = output.shape[0]

    def prep(x):
        x = jnp.ravel(x)
        rem = n % LANES
        if rem:
            # Only pad to 128-lane granularity (zeros contribute 0 to the loss).
            x = jnp.pad(x, (0, LANES - rem))
        return x.reshape(-1, LANES)          # keep native dtype; cast in-kernel

    pred2 = prep(output)
    lab2 = prep(label)
    flag2 = prep(flag)
    ip = jnp.asarray(inverse_propensity, dtype=jnp.float32)

    rows = pred2.shape[0]
    row_block = min(_ceil_to(max_row_block, 8), _ceil_to(rows, 8))
    nblocks = -(-rows // row_block)
    splits = num_splits if (num_splits > 1 and nblocks % num_splits == 0) else 1
    steps = nblocks // splits
    need_mask = (rows % row_block) != 0      # only the last (edge) block is ragged

    kernel = _make_kernel(row_block, steps, rows, need_mask)

    vec_spec = pl.BlockSpec((row_block, LANES), lambda c, i: (c * steps + i, 0))

    in_bytes = sum(int(x.size) * x.dtype.itemsize for x in (pred2, lab2, flag2))
    cost = pl.CostEstimate(
        flops=12 * rows * LANES,
        transcendentals=0,
        bytes_accessed=in_bytes + int(ip.size) * 4 + splits * 8 * LANES * 4,
    )

    lead_sem = pltpu.CORE_PARALLEL if core_parallel else "parallel"

    acc = pl.pallas_call(
        kernel,
        out_shape=jax.ShapeDtypeStruct((splits * 8, LANES), jnp.float32),
        grid=(splits, steps),
        in_specs=[
            pl.BlockSpec(memory_space=pltpu.MemorySpace.SMEM),  # inverse_propensity (2,)
            vec_spec,   # output (predictions)
            vec_spec,   # label
            vec_spec,   # flag
        ],
        # Each split owns one (8,128) slab, resident across the reduction axis.
        out_specs=pl.BlockSpec((8, LANES), lambda c, i: (c, 0)),
        compiler_params=pltpu.CompilerParams(
            dimension_semantics=(lead_sem, "arbitrary"),
            vmem_limit_bytes=32 * 1024 * 1024),
        cost_estimate=cost,
    )(ip, pred2, lab2, flag2)

    # Tiny final reduction of (splits*8, 128) partials -> scalar.
    return jnp.sum(acc)


def drm_loss_ref(output, label, inverse_propensity, flag):
    """Pure-JAX reference mirroring the PyTorch forward."""
    sq = (label - output) ** 2
    idx = (label.astype(jnp.int32) + 1) // 2
    ip_val = jnp.where(idx == 1, inverse_propensity[1], inverse_propensity[0])
    weight = jnp.where(flag == 1.0, ip_val, 0.0)
    ips = jnp.sum(weight * sq)
    loss1 = ips - 0.001 * jnp.sum(sq)
    loss2 = 0.001 * jnp.sum(sq * (1.0 - flag))
    return loss1 + loss2


if __name__ == "__main__":
    key = jax.random.PRNGKey(0)
    k_out, k_lab, k_flag = jax.random.split(key, 3)

    N = 2048  # number of samples

    # model scores
    output = jax.random.normal(k_out, (N,), dtype=jnp.float32)
    # labels in {-1, +1}, as the original indexing int((label+1)/2) implies
    label = 2.0 * jax.random.bernoulli(k_lab, 0.5, (N,)).astype(jnp.float32) - 1.0
    # observation flag in {0, 1}
    flag = jax.random.bernoulli(k_flag, 0.7, (N,)).astype(jnp.float32)
    # inverse propensity for the two label classes
    inverse_propensity = jnp.array([1.8, 2.3], dtype=jnp.float32)

    expected = drm_loss_ref(output, label, inverse_propensity, flag)

    # Default config: one large tile for this small N.
    loss = drm_loss(output, label, inverse_propensity, flag)
    jax.block_until_ready(loss)
    assert jnp.allclose(loss, expected, rtol=1e-4, atol=1e-4), (loss, expected)

    # Multi-step sequential accumulation path (grid = (1, 2)).
    loss_seq = drm_loss(output, label, inverse_propensity, flag, max_row_block=8)
    jax.block_until_ready(loss_seq)
    assert jnp.allclose(loss_seq, expected, rtol=1e-4, atol=1e-4), (loss_seq, expected)

    # 2-way split path (grid = (2, 1)); leading axis kept "parallel" here
    # (core_parallel=True is the v7x-only switch, not exercised in this test).
    loss_par = drm_loss(output, label, inverse_propensity, flag,
                        max_row_block=8, num_splits=2)
    jax.block_until_ready(loss_par)
    assert jnp.allclose(loss_par, expected, rtol=1e-4, atol=1e-4), (loss_par, expected)

    # Unaligned N: exercises the 128-lane tail pad + in-kernel row mask on the
    # ragged edge block (rows=14, single edge block at default tile).
    N2 = 1700
    out2, lab2, flg2 = output[:N2], label[:N2], flag[:N2]
    expected2 = drm_loss_ref(out2, lab2, inverse_propensity, flg2)
    loss_pad = drm_loss(out2, lab2, inverse_propensity, flg2)
    jax.block_until_ready(loss_pad)
    assert jnp.allclose(loss_pad, expected2, rtol=1e-4, atol=1e-4), (loss_pad, expected2)

    # Same unaligned N with small tiles: multi-step + masked partial edge block.
    loss_pad_seq = drm_loss(out2, lab2, inverse_propensity, flg2, max_row_block=8)
    jax.block_until_ready(loss_pad_seq)
    assert jnp.allclose(loss_pad_seq, expected2, rtol=1e-4, atol=1e-4), (loss_pad_seq, expected2)

    # Narrow-dtype streaming: label in bf16 (+/-1 exact), flag in int8 (0/1 exact);
    # the kernel casts in-VMEM so HBM bytes drop without changing the result.
    loss_narrow = drm_loss(output, label.astype(jnp.bfloat16),
                           inverse_propensity, flag.astype(jnp.int8))
    jax.block_until_ready(loss_narrow)
    assert jnp.allclose(loss_narrow, expected, rtol=1e-4, atol=1e-4), (loss_narrow, expected)

    print("KERNEL_OK")
</pallas_src>

<mosaic_0001>
module attributes {stable_mosaic.version = 11 : i64} {
  func.func @kernel(%arg0: i32, %arg1: i32, %arg2: memref<2xf32, #tpu.memory_space<smem>>, %arg3: memref<16x128xf32, #tpu.memory_space<vmem>>, %arg4: memref<16x128xf32, #tpu.memory_space<vmem>>, %arg5: memref<16x128xf32, #tpu.memory_space<vmem>>, %arg6: memref<8x128xf32, #tpu.memory_space<vmem>>) attributes {dimension_semantics = [#tpu.dimension_semantics<parallel>, #tpu.dimension_semantics<arbitrary>], iteration_bounds = array<i64: 1, 1>, scalar_prefetch = 0 : i64, scratch_operands = 0 : i64, tpu.core_type = #tpu.core_type<tc>, window_params = [{transform_indices = @transform_0, window_bounds = array<i64: 2>}, {transform_indices = @transform_1, window_bounds = array<i64: 16, 128>}, {transform_indices = @transform_2, window_bounds = array<i64: 16, 128>}, {transform_indices = @transform_3, window_bounds = array<i64: 16, 128>}, {transform_indices = @transform_4, window_bounds = array<i64: 8, 128>}]} {
    %c0_i32 = arith.constant 0 : i32
    %0 = arith.cmpi eq, %arg1, %c0_i32 : i32
    %1 = arith.extui %0 : i1 to i32
    %c0_i32_0 = arith.constant 0 : i32
    %2 = arith.cmpi ne, %1, %c0_i32_0 : i32
    scf.if %2 {
      %cst_14 = arith.constant 0.000000e+00 : f32
      %33 = vector.broadcast %cst_14 : f32 to vector<8x128xf32>
      %c0_15 = arith.constant 0 : index
      %c0_16 = arith.constant 0 : index
      %34 = vector.load %arg6[%c0_15, %c0_16] : memref<8x128xf32, #tpu.memory_space<vmem>>, vector<8x128xf32>
      tpu.vector_store %arg6[%c0_15, %c0_16], %33 {strides = array<i32>} : memref<8x128xf32, #tpu.memory_space<vmem>>, vector<8x128xf32>,
    } else {
    }
    %c0 = arith.constant 0 : index
    %c0_1 = arith.constant 0 : index
    %3 = vector.load %arg3[%c0, %c0_1] : memref<16x128xf32, #tpu.memory_space<vmem>>, vector<16x128xf32>
    %c0_2 = arith.constant 0 : index
    %c0_3 = arith.constant 0 : index
    %4 = vector.load %arg4[%c0_2, %c0_3] : memref<16x128xf32, #tpu.memory_space<vmem>>, vector<16x128xf32>
    %c0_4 = arith.constant 0 : index
    %c0_5 = arith.constant 0 : index
    %5 = vector.load %arg5[%c0_4, %c0_5] : memref<16x128xf32, #tpu.memory_space<vmem>>, vector<16x128xf32>
    %6 = arith.subf %4, %3 : vector<16x128xf32>
    %7 = arith.mulf %6, %6 : vector<16x128xf32>
    %c0_6 = arith.constant 0 : index
    %8 = memref.load %arg2[%c0_6] : memref<2xf32, #tpu.memory_space<smem>>
    %c1 = arith.constant 1 : index
    %9 = memref.load %arg2[%c1] : memref<2xf32, #tpu.memory_space<smem>>
    %10 = arith.subf %9, %8 : f32
    %cst = arith.constant 0.000000e+00 : f32
    %11 = vector.broadcast %cst : f32 to vector<16x128xf32>
    %12 = arith.cmpf ogt, %4, %11 : vector<16x128xf32>
    %13 = arith.extui %12 : vector<16x128xi1> to vector<16x128xi32>
    %14 = arith.sitofp %13 : vector<16x128xi32> to vector<16x128xf32>
    %cst_7 = arith.constant 1.000000e+00 : f32
    %15 = vector.broadcast %cst_7 : f32 to vector<16x128xf32>
    %16 = arith.cmpf oeq, %5, %15 : vector<16x128xf32>
    %17 = arith.extui %16 : vector<16x128xi1> to vector<16x128xi32>
    %18 = arith.sitofp %17 : vector<16x128xi32> to vector<16x128xf32>
    %19 = vector.broadcast %10 : f32 to vector<16x128xf32>
    %20 = arith.mulf %19, %14 : vector<16x128xf32>
    %21 = vector.broadcast %8 : f32 to vector<16x128xf32>
    %22 = arith.addf %21, %20 : vector<16x128xf32>
    %23 = arith.mulf %18, %22 : vector<16x128xf32>
    %cst_8 = arith.constant 1.000000e-03 : f32
    %24 = vector.broadcast %cst_8 : f32 to vector<16x128xf32>
    %25 = arith.mulf %24, %5 : vector<16x128xf32>
    %26 = arith.subf %23, %25 : vector<16x128xf32>
    %27 = arith.mulf %7, %26 : vector<16x128xf32>
    %28 = vector.shape_cast %27 : vector<16x128xf32> to vector<2x8x128xf32>
    %cst_9 = arith.constant dense<0.000000e+00> : vector<8x128xf32>
    %29 = vector.multi_reduction <add>, %28, %cst_9 [0] : vector<2x8x128xf32> to vector<8x128xf32>
    %c0_10 = arith.constant 0 : index
    %c0_11 = arith.constant 0 : index
    %30 = vector.load %arg6[%c0_10, %c0_11] : memref<8x128xf32, #tpu.memory_space<vmem>>, vector<8x128xf32>
    %31 = arith.addf %30, %29 : vector<8x128xf32>
    %c0_12 = arith.constant 0 : index
    %c0_13 = arith.constant 0 : index
    %32 = vector.load %arg6[%c0_12, %c0_13] : memref<8x128xf32, #tpu.memory_space<vmem>>, vector<8x128xf32>
    tpu.vector_store %arg6[%c0_12, %c0_13], %31 {strides = array<i32>} : memref<8x128xf32, #tpu.memory_space<vmem>>, vector<8x128xf32>,
    return
  }
  func.func @transform_0(%arg0: i32, %arg1: i32) -> i32 {
    %c0_i32 = arith.constant 0 : i32
    %c0_i32_0 = arith.constant 0 : i32
    return %c0_i32 : i32
  }
  func.func @transform_1(%arg0: i32, %arg1: i32) -> (i32, i32) {
    %c1_i32 = arith.constant 1 : i32
    %0 = arith.muli %arg0, %c1_i32 : i32
    %1 = arith.addi %0, %arg1 : i32
    %c0_i32 = arith.constant 0 : i32
    %c0_i32_0 = arith.constant 0 : i32
    return %1, %c0_i32 : i32, i32
  }
  func.func @transform_2(%arg0: i32, %arg1: i32) -> (i32, i32) {
    %c1_i32 = arith.constant 1 : i32
    %0 = arith.muli %arg0, %c1_i32 : i32
    %1 = arith.addi %0, %arg1 : i32
    %c0_i32 = arith.constant 0 : i32
    %c0_i32_0 = arith.constant 0 : i32
    return %1, %c0_i32 : i32, i32
  }
  func.func @transform_3(%arg0: i32, %arg1: i32) -> (i32, i32) {
    %c1_i32 = arith.constant 1 : i32
    %0 = arith.muli %arg0, %c1_i32 : i32
    %1 = arith.addi %0, %arg1 : i32
    %c0_i32 = arith.constant 0 : i32
    %c0_i32_0 = arith.constant 0 : i32
    return %1, %c0_i32 : i32, i32
  }
  func.func @transform_4(%arg0: i32, %arg1: i32) -> (i32, i32) {
    %c0_i32 = arith.constant 0 : i32
    %c0_i32_0 = arith.constant 0 : i32
    return %arg0, %c0_i32 : i32, i32
  }
}

</mosaic_0001>

<bundles_post_ra>
// kernel: tpu_custom_call.1
= control target key start
LH: loop header
LB: loop body
LE: loop exit
PB: predicated region body
PF: predicated region fallthrough
CT: control target
= control target key end

     0   :  { %9 = vsyncpa [#allocation5], 0  ;;  %s374_s0 = inlined_call_operand.hbm [shape: f32[2], index: 0, kind: input, shape index: {}]   ;;  %s375_s1 = inlined_call_operand.hbm [shape: f32[16,128], index: 1, kind: input, shape index: {}]   ;;  %s376_s2 = inlined_call_operand.hbm [shape: f32[16,128], index: 2, kind: input, shape index: {}]   ;;  %s377_s3 = inlined_call_operand.hbm [shape: f32[16,128], index: 3, kind: input, shape index: {}]   ;;  %s378_s4 = inlined_call_operand.hbm [shape: f32[8,128], index: 4, kind: output, shape index: {}]  }
   0x1   :  { %10 = vsyncpa [#allocation3], 0 }
   0x2   :  { %11 = vsyncpa [#allocation8], 0 }
   0x3   :  { %12 = vsyncpa [#allocation4], 0  ;;  %s272_s15 = smov [#allocation7]   ;;  %s273_s17 = smov [#allocation6]  }
   0x4   :  { %s46_s16 = sshll.u32 %s272_s15, 4  ;;  %s30_s18 = sshll.u32 %s273_s17, 4  ;;  %s47_s16 = int_to_ptr.vmem [resolvable:$true] %s46_s16  ;;  %s31_s18 = int_to_ptr.vmem [resolvable:$true] %s30_s18 }
   0x5   :  { %s166_s21 = scalar_lea.hbm %s376_s2, 256 }
   0x6   :  { %p167_p0 = scmp.ne.s32.totalorder %s376_s2, %s166_s21  ;;  %p170_p1 = scmp.lt.u32.totalorder %s166_s21, %s376_s2 }
   0x8   :  { %p172_p2 = pnand %p170_p1, %p167_p0 }
   0xa   :  { %175 = shalt.err (!%p172_p2)
}
   0xb   :  { %s176_s26 = scalar_lea.vmem %s47_s16, 256  ;;  %p181_p4 = scmp.lt.s32.totalorder %s47_s16, %s47_s16 }
   0xc   :  { %p177_p3 = scmp.ne.s32.totalorder %s47_s16, %s176_s26  ;;  %p182_p5 = scmp.lt.s32.totalorder %s176_s26, %s176_s26 }
   0xe   :  { %p183_p6 = por %p182_p5, %p181_p4 }
  0x10   :  { %p184_p7 = pnand %p183_p6, %p177_p3 }
  0x12   :  { %187 = shalt.err (!%p184_p7)
}
  0x13   :  { %s274_s27 = smov 128   ;;  %s275_s28 = smov 8  }
  0x14   :  { %52 = dma.hbm_to_vmem [thread:$0]  %s376_s2, 256, %s47_s16, [#allocation8], %s274_s27, %s274_s27, %s275_s28  }
  0x15   :  { %s188_s7 = scalar_lea.hbm %s374_s0, 16 }
  0x16   :  { %p189_p8 = scmp.ne.s32.totalorder %s374_s0, %s188_s7  ;;  %p192_p9 = scmp.lt.u32.totalorder %s188_s7, %s374_s0 }
  0x18   :  { %p194_p10 = pnand %p192_p9, %p189_p8 }
  0x1a   :  { %197 = shalt.err (!%p194_p10)
}
  0x1b   :  { %s276_s12 = smov [#allocation2]   ;;  %s198_s16 = scalar_lea.hbm %s375_s1, 256 }
  0x1c   :  { %20 = dma.hbm_to_smem %s374_s0, 16, %s276_s12, [#allocation5]  }
  0x1d   :  { %p199_p11 = scmp.ne.s32.totalorder %s375_s1, %s198_s16  ;;  %p202_p12 = scmp.lt.u32.totalorder %s198_s16, %s375_s1 }
  0x1f   :  { %p204_p13 = pnand %p202_p12, %p199_p11 }
  0x21   :  { %207 = shalt.err (!%p204_p13)
}
  0x22   :  { %s208_s22 = scalar_lea.vmem %s31_s18, 256  ;;  %p213_p1 = scmp.lt.s32.totalorder %s31_s18, %s31_s18 }
  0x23   :  { %p209_p0 = scmp.ne.s32.totalorder %s31_s18, %s208_s22  ;;  %p214_p2 = scmp.lt.s32.totalorder %s208_s22, %s208_s22 }
  0x25   :  { %p215_p3 = por %p214_p2, %p213_p1 }
  0x27   :  { %p216_p4 = pnand %p215_p3, %p209_p0 }
  0x29   :  { %219 = shalt.err (!%p216_p4)
}
  0x2a   :  { %36 = dma.hbm_to_vmem [thread:$0]  %s375_s1, 256, %s31_s18, [#allocation3], %s274_s27, %s274_s27, %s275_s28  }
  0x2b   :  { %s277_s24 = smov [#allocation9]   ;;  %s220_s30 = scalar_lea.hbm %s377_s3, 256 }
  0x2c   :  { %s62_s25 = sshll.u32 %s277_s24, 4  ;;  %p221_p5 = scmp.ne.s32.totalorder %s377_s3, %s220_s30  ;;  %s63_s25 = int_to_ptr.vmem [resolvable:$true] %s62_s25 }
  0x2d   :  { %p224_p6 = scmp.lt.u32.totalorder %s220_s30, %s377_s3 }
  0x2f   :  { %p226_p7 = pnand %p224_p6, %p221_p5 }
  0x31   :  { %229 = shalt.err (!%p226_p7)
}
  0x32   :  { %s230_s9 = scalar_lea.vmem %s63_s25, 256  ;;  %p235_p9 = scmp.lt.s32.totalorder %s63_s25, %s63_s25 }
  0x33   :  { %p231_p8 = scmp.ne.s32.totalorder %s63_s25, %s230_s9  ;;  %p236_p10 = scmp.lt.s32.totalorder %s230_s9, %s230_s9 }
  0x35   :  { %p237_p11 = por %p236_p10, %p235_p9 }
  0x37   :  { %p238_p12 = pnand %p237_p11, %p231_p8 }
  0x39   :  { %241 = shalt.err (!%p238_p12)
}
  0x3a   :  { %68 = dma.hbm_to_vmem [thread:$0]  %s377_s3, 256, %s63_s25, [#allocation8], %s274_s27, %s274_s27, %s275_s28  }
  0x3b   :  { %264 = dma.done.wait [#allocation5], 16  }
  0x3c   :  { %265 = vsyncadd [#allocation5], 4294967280 }
  0x3d   :  { %266 = dma.done.wait [#allocation3], 256  }
  0x3e   :  { %267 = vsyncadd [#allocation3], 4294967040 }
  0x3f   :  { %268 = dma.done.wait [#allocation8], 512  }
  0x40   :  { %269 = vsyncadd [#allocation8], 4294966784 }
  0x41   :  { %81 = sfence }
  0x42   :  { %s103_s10 = sld [smem:[#allocation2]]  ;;  %v95_v0 = vld [vmem:[#allocation7] sm:$0xff]  ;;  %v96_v1 = vld [vmem:[#allocation7 + $0x8] sm:$0xff]  ;;  %s153_s11 = sld [smem:[#allocation2 + $0x1]]  ;;  %v97_v2 = vld [vmem:[#allocation9] sm:$0xff]  ;;  %v278_v6 = vmov 0.0  }
  0x43   :  { %vm106_vm0 = vcmp.gt.f32.partialorder %v95_v0, 0.0  ;;  %vm107_vm1 = vcmp.gt.f32.partialorder %v96_v1, 0.0  ;;  %v98_v3 = vld [vmem:[#allocation9 + $0x8] sm:$0xff]  ;;  %v93_v4 = vld [vmem:[#allocation6] sm:$0xff]  ;;  %vm112_vm2 = vcmp.eq.f32.partialorder %v97_v2, 1.0  ;;  %s279_s3 = smov [#allocation10]  }
  0x44   :  { %v94_v5 = vld [vmem:[#allocation6 + $0x8] sm:$0xff]  ;;  %v154_v7 = vsel %vm106_vm0, 1.0, %v278_v6  ;;  %v155_v8 = vsel %vm107_vm1, 1.0, %v278_v6  ;;  %vm113_vm3 = vcmp.eq.f32.partialorder %v98_v3, 1.0  ;;  %v99_v11 = vsub.f32 %v95_v0, %v93_v4  ;;  %s142_s27 = sshll.u32 %s279_s3, 4  ;;  %s143_s27 = int_to_ptr.vmem [resolvable:$true] %s142_s27 }
  0x45   :  { %v100_v12 = vsub.f32 %v96_v1, %v94_v5  ;;  %v156_v15 = vsel %vm112_vm2, 1.0, %v278_v6  ;;  %v157_v16 = vsel %vm113_vm3, 1.0, %v278_v6  ;;  %v126_v19 = vmul.f32 0.001, %v97_v2  ;;  %s242_s28 = scalar_lea.vmem %s143_s27, 128  ;;  %p247_p0 = scmp.lt.s32.totalorder %s143_s27, %s143_s27 }
  0x46   :  { %v127_v20 = vmul.f32 0.001, %v98_v3  ;;  %v101_v21 = vmul.f32 %v99_v11, %v99_v11  ;;  %p243_p13 = scmp.ne.s32.totalorder %s143_s27, %s242_s28  ;;  %p248_p1 = scmp.lt.s32.totalorder %s242_s28, %s242_s28 }
  0x47   :  { %v102_v22 = vmul.f32 %v100_v12, %v100_v12 }
  0x48   :  { %s105_s12 = ssub.f32 %s153_s11, %s103_s10  ;;  %v121_v10 = vstv %s103_s10  ;;  %p249_p2 = por %p248_p1, %p247_p0 }
  0x4a   :  { %v118_v9 = vstv %s105_s12  ;;  %p250_p3 = pnand %p249_p2, %p243_p13 }
  0x4b   :  { %v119_v13 = vmul.f32 %v154_v7, %v118_v9  ;;  %v120_v14 = vmul.f32 %v155_v8, %v118_v9 }
  0x4d   :  { %v122_v17 = vadd.f32 %v121_v10, %v119_v13  ;;  %v123_v18 = vadd.f32 %v121_v10, %v120_v14 }
  0x4f   :  { %v124_v23 = vmul.f32 %v156_v15, %v122_v17  ;;  %v125_v24 = vmul.f32 %v157_v16, %v123_v18 }
  0x51   :  { %v128_v25 = vsub.f32 %v124_v23, %v126_v19  ;;  %v129_v26 = vsub.f32 %v125_v24, %v127_v20 }
  0x53   :  { %v130_v27 = vmul.f32 %v128_v25, %v101_v21  ;;  %v131_v28 = vmul.f32 %v129_v26, %v102_v22 }
  0x55   :  { %v132_v29 = vadd.f32 %v131_v28, %v130_v27 }
  0x57   :  { %135 = vst [vmem:[#allocation10] sm:$0xff] %v132_v29 }
  0x58   :  { %253 = shalt.err (!%p250_p3)
}
  0x59   :  { %s254_s2 = scalar_lea.hbm %s378_s4, 128 }
  0x5a   :  { %p255_p4 = scmp.ne.s32.totalorder %s378_s4, %s254_s2  ;;  %p258_p5 = scmp.lt.u32.totalorder %s254_s2, %s378_s4 }
  0x5c   :  { %p260_p6 = pnand %p258_p5, %p255_p4 }
  0x5e   :  { %263 = shalt.err (!%p260_p6)
}
  0x5f   :  { %145 = dma.vmem_to_hbm [thread:$0]  %s143_s27, 128, %s378_s4, [#allocation4]  }
  0x60   :  { %270 = dma.done.wait [#allocation4], 128  }
  0x61   :  { %271 = vsyncadd [#allocation4], 4294967168 }
  0x62   :  { %149 = vsyncpa [#allocation3], 1 }
  0x63   :  { %150 = vsyncpa [#allocation8], 1 }
  0x64   :  { %151 = vsyncpa [#allocation4], 1 }
  0x65   :  { %152 = vsyncpa [#allocation5], 1 }

</bundles_post_ra>
